<compile_context>
chip_gen: v6e
topology: v6e:2x2x1
jax: 0.10.0
libtpu: 0.0.40
codegen_flags: <defaults>
</compile_context>

<pallas_src>
import functools

import jax
import jax.numpy as jnp
from jax import lax
from jax.experimental import pallas as pl
from jax.experimental.pallas import tpu as pltpu


_INV_SQRT2 = 0.7071067811865476  # 1/sqrt(2)


def _mlp_kernel(x_ref, w1_ref, b1_ref, w2_ref, b2_ref, o_ref):
    """One grid step: a (tile_n, D_in) slab of tokens through fc1 -> GELU -> fc2."""
    x = x_ref[...].astype(jnp.float32)                                   # (T, Din)

    # fc1: x @ W1 + b1  (MXU, f32 accumulate)
    h = jnp.dot(x, w1_ref[...].astype(jnp.float32),
                preferred_element_type=jnp.float32)                      # (T, H)
    h = h + b1_ref[...].astype(jnp.float32)                              # bias broadcast (1, H)

    # Exact GELU (PyTorch nn.GELU default, approximate='none'):
    #   gelu(x) = 0.5 * x * (1 + erf(x / sqrt(2)))
    h = 0.5 * h * (1.0 + lax.erf(h * _INV_SQRT2))

    # fc2: h @ W2 + b2
    y = jnp.dot(h, w2_ref[...].astype(jnp.float32),
                preferred_element_type=jnp.float32)                      # (T, Dout)
    y = y + b2_ref[...].astype(jnp.float32)

    # TODO(synk): nn.Dropout(drop) — reference config uses drop=0.0 (and inference mode),
    # so dropout is the identity and is not materialized here.
    o_ref[...] = y.astype(o_ref.dtype)


def _round_up(x, m):
    return (x + m - 1) // m * m


@functools.partial(jax.jit, static_argnames=("tile_n",))
def mlp_forward(x, fc1_weight, fc1_bias, fc2_weight, fc2_bias, tile_n=256):
    """Fused MLP forward.

    x          : (..., in_features)
    fc1_weight : (hidden_features, in_features)   -- PyTorch nn.Linear layout
    fc1_bias   : (hidden_features,)
    fc2_weight : (out_features, hidden_features)
    fc2_bias   : (out_features,)
    """
    orig_shape = x.shape
    d_in = orig_shape[-1]
    d_hidden = fc1_weight.shape[0]
    d_out = fc2_weight.shape[0]

    flat = x.reshape(-1, d_in)
    n = flat.shape[0]

    # Pick a sublane-aligned tile of tokens; pad N up instead of asserting divisibility.
    tile = min(int(tile_n), _round_up(n, 8))
    tile = _round_up(tile, 8)
    n_pad = _round_up(n, tile)
    if n_pad != n:
        flat = jnp.pad(flat, ((0, n_pad - n), (0, 0)))
    grid = (n_pad // tile,)

    # Pre-transpose weights so the kernel does plain row-major x @ W matmuls.
    w1 = fc1_weight.T            # (in, hidden)
    w2 = fc2_weight.T            # (hidden, out)
    b1 = fc1_bias.reshape(1, d_hidden)
    b2 = fc2_bias.reshape(1, d_out)

    out = pl.pallas_call(
        _mlp_kernel,
        out_shape=jax.ShapeDtypeStruct((n_pad, d_out), x.dtype),
        grid_spec=pltpu.PrefetchScalarGridSpec(
            num_scalar_prefetch=0,
            grid=grid,
            in_specs=[
                pl.BlockSpec((tile, d_in), lambda i: (i, 0)),        # token slab
                pl.BlockSpec((d_in, d_hidden), lambda i: (0, 0)),    # W1 (resident)
                pl.BlockSpec((1, d_hidden), lambda i: (0, 0)),       # b1 (resident)
                pl.BlockSpec((d_hidden, d_out), lambda i: (0, 0)),   # W2 (resident)
                pl.BlockSpec((1, d_out), lambda i: (0, 0)),          # b2 (resident)
            ],
            out_specs=pl.BlockSpec((tile, d_out), lambda i: (i, 0)),
        ),
        compiler_params=pltpu.CompilerParams(
            # Token tiles are fully independent -> shard across v7x's two TensorCores.
            dimension_semantics=("parallel",)),
    )(flat, w1, b1, w2, b2)

    if n_pad != n:
        out = out[:n]
    return out.reshape(orig_shape[:-1] + (d_out,))


if __name__ == "__main__":
    # Small, lane-friendly shapes consistent with the module: tokens = B*S, ViT-style 4x-ish MLP.
    B, S = 2, 64
    IN_FEATURES, HIDDEN_FEATURES, OUT_FEATURES = 128, 256, 128

    key = jax.random.PRNGKey(0)
    kx, kw1, kb1, kw2, kb2 = jax.random.split(key, 5)

    x = jax.random.normal(kx, (B, S, IN_FEATURES), dtype=jnp.float32)

    # nn.Linear default init: U(-1/sqrt(fan_in), 1/sqrt(fan_in)) for weight and bias.
    bound1 = 1.0 / (IN_FEATURES ** 0.5)
    fc1_weight = jax.random.uniform(kw1, (HIDDEN_FEATURES, IN_FEATURES),
                                    dtype=jnp.float32, minval=-bound1, maxval=bound1)
    fc1_bias = jax.random.uniform(kb1, (HIDDEN_FEATURES,),
                                  dtype=jnp.float32, minval=-bound1, maxval=bound1)
    bound2 = 1.0 / (HIDDEN_FEATURES ** 0.5)
    fc2_weight = jax.random.uniform(kw2, (OUT_FEATURES, HIDDEN_FEATURES),
                                    dtype=jnp.float32, minval=-bound2, maxval=bound2)
    fc2_bias = jax.random.uniform(kb2, (OUT_FEATURES,),
                                  dtype=jnp.float32, minval=-bound2, maxval=bound2)

    y = mlp_forward(x, fc1_weight, fc1_bias, fc2_weight, fc2_bias)
    jax.block_until_ready(y)

    assert y.shape == (B, S, OUT_FEATURES)
    assert y.dtype == x.dtype
    print("KERNEL_OK")
</pallas_src>

<mosaic_0001>
module attributes {stable_mosaic.version = 11 : i64} {
  func.func @_mlp_kernel(%arg0: i32, %arg1: memref<128x128xf32, #tpu.memory_space<vmem>>, %arg2: memref<128x256xf32, #tpu.memory_space<vmem>>, %arg3: memref<1x256xf32, #tpu.memory_space<vmem>>, %arg4: memref<256x128xf32, #tpu.memory_space<vmem>>, %arg5: memref<1x128xf32, #tpu.memory_space<vmem>>, %arg6: memref<128x128xf32, #tpu.memory_space<vmem>>) attributes {dimension_semantics = [#tpu.dimension_semantics<parallel>], iteration_bounds = array<i64: 1>, scalar_prefetch = 0 : i64, scratch_operands = 0 : i64, tpu.core_type = #tpu.core_type<tc>, window_params = [{transform_indices = @transform_0, window_bounds = array<i64: 128, 128>}, {pipeline_mode = #tpu.pipeline_mode<synchronous>, transform_indices = @transform_1, window_bounds = array<i64: 128, 256>}, {pipeline_mode = #tpu.pipeline_mode<synchronous>, transform_indices = @transform_2, window_bounds = array<i64: 1, 256>}, {pipeline_mode = #tpu.pipeline_mode<synchronous>, transform_indices = @transform_3, window_bounds = array<i64: 256, 128>}, {pipeline_mode = #tpu.pipeline_mode<synchronous>, transform_indices = @transform_4, window_bounds = array<i64: 1, 128>}, {transform_indices = @transform_5, window_bounds = array<i64: 128, 128>}]} {
    %c0 = arith.constant 0 : index
    %c0_0 = arith.constant 0 : index
    %0 = vector.load %arg1[%c0, %c0_0] : memref<128x128xf32, #tpu.memory_space<vmem>>, vector<128x128xf32>
    %c0_1 = arith.constant 0 : index
    %c0_2 = arith.constant 0 : index
    %1 = vector.load %arg2[%c0_1, %c0_2] : memref<128x256xf32, #tpu.memory_space<vmem>>, vector<128x256xf32>
    %cst = arith.constant dense<0.000000e+00> : vector<128x256xf32>
    %2 = tpu.matmul %0, %1, %cst {dimension_numbers = #tpu.dot_dimension_numbers<[1], [0], [0], [1], [0, 0, 1, 1], [], []>} : vector<128x128xf32>, vector<128x256xf32>, vector<128x256xf32> -> vector<128x256xf32>
    %c0_3 = arith.constant 0 : index
    %c0_4 = arith.constant 0 : index
    %3 = vector.load %arg3[%c0_3, %c0_4] : memref<1x256xf32, #tpu.memory_space<vmem>>, vector<1x256xf32>
    %4 = vector.broadcast %3 : vector<1x256xf32> to vector<128x256xf32>
    %5 = arith.addf %2, %4 : vector<128x256xf32>
    %cst_5 = arith.constant 5.000000e-01 : f32
    %6 = vector.broadcast %cst_5 : f32 to vector<128x256xf32>
    %7 = arith.mulf %6, %5 : vector<128x256xf32>
    %cst_6 = arith.constant 0.707106769 : f32
    %8 = vector.broadcast %cst_6 : f32 to vector<128x256xf32>
    %9 = arith.mulf %5, %8 : vector<128x256xf32>
    %10 = math.erf %9 : vector<128x256xf32>
    %cst_7 = arith.constant 1.000000e+00 : f32
    %11 = vector.broadcast %cst_7 : f32 to vector<128x256xf32>
    %12 = arith.addf %11, %10 : vector<128x256xf32>
    %13 = arith.mulf %7, %12 : vector<128x256xf32>
    %c0_8 = arith.constant 0 : index
    %c0_9 = arith.constant 0 : index
    %14 = vector.load %arg4[%c0_8, %c0_9] : memref<256x128xf32, #tpu.memory_space<vmem>>, vector<256x128xf32>
    %cst_10 = arith.constant dense<0.000000e+00> : vector<128x128xf32>
    %15 = tpu.matmul %13, %14, %cst_10 {dimension_numbers = #tpu.dot_dimension_numbers<[1], [0], [0], [1], [0, 0, 1, 1], [], []>} : vector<128x256xf32>, vector<256x128xf32>, vector<128x128xf32> -> vector<128x128xf32>
    %c0_11 = arith.constant 0 : index
    %c0_12 = arith.constant 0 : index
    %16 = vector.load %arg5[%c0_11, %c0_12] : memref<1x128xf32, #tpu.memory_space<vmem>>, vector<1x128xf32>
    %17 = vector.broadcast %16 : vector<1x128xf32> to vector<128x128xf32>
    %18 = arith.addf %15, %17 : vector<128x128xf32>
    %c0_13 = arith.constant 0 : index
    %c0_14 = arith.constant 0 : index
    %19 = vector.load %arg6[%c0_13, %c0_14] : memref<128x128xf32, #tpu.memory_space<vmem>>, vector<128x128xf32>
    tpu.vector_store %arg6[%c0_13, %c0_14], %18 {strides = array<i32>} : memref<128x128xf32, #tpu.memory_space<vmem>>, vector<128x128xf32>,
    return
  }
  func.func @transform_0(%arg0: i32) -> (i32, i32) {
    %c0_i32 = arith.constant 0 : i32
    %c0_i32_0 = arith.constant 0 : i32
    return %arg0, %c0_i32 : i32, i32
  }
  func.func @transform_1(%arg0: i32) -> (i32, i32) {
    %c0_i32 = arith.constant 0 : i32
    %c0_i32_0 = arith.constant 0 : i32
    %c0_i32_1 = arith.constant 0 : i32
    return %c0_i32, %c0_i32_0 : i32, i32
  }
  func.func @transform_2(%arg0: i32) -> (i32, i32) {
    %c0_i32 = arith.constant 0 : i32
    %c0_i32_0 = arith.constant 0 : i32
    %c0_i32_1 = arith.constant 0 : i32
    return %c0_i32, %c0_i32_0 : i32, i32
  }
  func.func @transform_3(%arg0: i32) -> (i32, i32) {
    %c0_i32 = arith.constant 0 : i32
    %c0_i32_0 = arith.constant 0 : i32
    %c0_i32_1 = arith.constant 0 : i32
    return %c0_i32, %c0_i32_0 : i32, i32
  }
  func.func @transform_4(%arg0: i32) -> (i32, i32) {
    %c0_i32 = arith.constant 0 : i32
    %c0_i32_0 = arith.constant 0 : i32
    %c0_i32_1 = arith.constant 0 : i32
    return %c0_i32, %c0_i32_0 : i32, i32
  }
  func.func @transform_5(%arg0: i32) -> (i32, i32) {
    %c0_i32 = arith.constant 0 : i32
    %c0_i32_0 = arith.constant 0 : i32
    return %arg0, %c0_i32 : i32, i32
  }
}

</mosaic_0001>

<bundles_post_ra>
// kernel: mlp_forward.1
= control target key start
LH: loop header
LB: loop body
LE: loop exit
PB: predicated region body
PF: predicated region fallthrough
CT: control target
= control target key end

     0   :  { %v789_v4 = vmov 0.0   ;;  %s1230_s0 = inlined_call_operand.vmem [shape: f32[128,128], index: 0, kind: input, shape index: {}]   ;;  %s1231_s1 = inlined_call_operand.vmem [shape: f32[128,256], index: 1, kind: input, shape index: {}]   ;;  %s1232_s2 = inlined_call_operand.vmem [shape: f32[1,256], index: 2, kind: input, shape index: {}]   ;;  %s1233_s3 = inlined_call_operand.vmem [shape: f32[256,128], index: 3, kind: input, shape index: {}]   ;;  %s1234_s4 = inlined_call_operand.vmem [shape: f32[1,128], index: 4, kind: input, shape index: {}]   ;;  %s1235_s5 = inlined_call_operand.hbm [shape: f32[128,128], index: 5, kind: output, shape index: {}]  }
   0x1   :  { %v68_v0 = vld [vmem:[%s1231_s1 + $0xf8] sm:$0xff]  ;;  %v67_v1 = vld [vmem:[%s1231_s1 + $0xf0] sm:$0xff]  ;;  %v66_v2 = vld [vmem:[%s1231_s1 + $0xe8] sm:$0xff]  ;;  %145 = vmatprep.mubr.f32.mxu0 %v789_v4 }
   0x2   :  { %81 = vmatprep.subr.mxu0 %v68_v0  ;;  %v65_v3 = vld [vmem:[%s1231_s1 + $0xe0] sm:$0xff]  ;;  %v64_v5 = vld [vmem:[%s1231_s1 + $0xd8] sm:$0xff]  ;;  %v63_v6 = vld [vmem:[%s1231_s1 + $0xd0] sm:$0xff] }
   0x3   :  { %82 = vmatpush1.msra.mxu0 %v67_v1  ;;  %v62_v7 = vld [vmem:[%s1231_s1 + $0xc8] sm:$0xff]  ;;  %v61_v8 = vld [vmem:[%s1231_s1 + $0xc0] sm:$0xff]  ;;  %v60_v9 = vld [vmem:[%s1231_s1 + $0xb8] sm:$0xff] }
   0x4   :  { %83 = vmatprep.subr.mxu0 %v66_v2  ;;  %v59_v10 = vld [vmem:[%s1231_s1 + $0xb0] sm:$0xff]  ;;  %v58_v11 = vld [vmem:[%s1231_s1 + $0xa8] sm:$0xff]  ;;  %v57_v12 = vld [vmem:[%s1231_s1 + $0xa0] sm:$0xff] }
   0x5   :  { %84 = vmatpush1.msra.mxu0 %v65_v3  ;;  %v56_v13 = vld [vmem:[%s1231_s1 + $0x98] sm:$0xff]  ;;  %v55_v14 = vld [vmem:[%s1231_s1 + $0x90] sm:$0xff]  ;;  %v54_v15 = vld [vmem:[%s1231_s1 + $0x88] sm:$0xff] }
   0x6   :  { %85 = vmatprep.subr.mxu0 %v64_v5  ;;  %v53_v16 = vld [vmem:[%s1231_s1 + $0x80] sm:$0xff]  ;;  %v52_v17 = vld [vmem:[%s1231_s1 + $0x78] sm:$0xff]  ;;  %v51_v18 = vld [vmem:[%s1231_s1 + $0x70] sm:$0xff] }
   0x7   :  { %86 = vmatpush1.msra.mxu0 %v63_v6  ;;  %v50_v19 = vld [vmem:[%s1231_s1 + $0x68] sm:$0xff]  ;;  %v433_v20 = vld [vmem:[%s1233_s3 + $0xf8] sm:$0xff]  ;;  %v432_v22 = vld [vmem:[%s1233_s3 + $0xf0] sm:$0xff] }
   0x8   :  { %87 = vmatprep.subr.mxu0 %v62_v7  ;;  %v417_v21 = vld [vmem:[%s1233_s3 + $0x78] sm:$0xff]  ;;  %v49_v23 = vld [vmem:[%s1231_s1 + $0x60] sm:$0xff]  ;;  %619 = vmatprep.subr.mxu1 %v433_v20  ;;  %v416_v24 = vld [vmem:[%s1233_s3 + $0x70] sm:$0xff] }
   0x9   :  { %88 = vmatpush1.msra.mxu0 %v61_v8  ;;  %v48_v25 = vld [vmem:[%s1231_s1 + $0x58] sm:$0xff]  ;;  %620 = vmatpush3.msra.mxu1 %v417_v21  ;;  %v431_v26 = vld [vmem:[%s1233_s3 + $0xe8] sm:$0xff] }
   0xa   :  { %89 = vmatprep.subr.mxu0 %v60_v9 }
   0xb   :  { %90 = vmatpush1.msra.mxu0 %v59_v10 }
   0xc   :  { %91 = vmatprep.subr.mxu0 %v58_v11 }
   0xd   :  { %92 = vmatpush1.msra.mxu0 %v57_v12 }
   0xe   :  { %93 = vmatprep.subr.mxu0 %v56_v13 }
   0xf   :  { %94 = vmatpush1.msra.mxu0 %v55_v14 }
  0x10   :  { %95 = vmatprep.subr.mxu0 %v54_v15 }
  0x11   :  { %96 = vmatpush1.msra.mxu0 %v53_v16 }
  0x12   :  { %97 = vmatprep.subr.mxu0 %v52_v17 }
  0x13   :  { %98 = vmatpush1.msra.mxu0 %v51_v18 }
  0x14   :  { %10 = vsyncpa [#allocation3], 0  ;;  %99 = vmatprep.subr.mxu0 %v50_v19  ;;  %v47_v27 = vld [vmem:[%s1231_s1 + $0x50] sm:$0xff]  ;;  %621 = vmatprep.subr.mxu1 %v432_v22  ;;  %v415_v28 = vld [vmem:[%s1233_s3 + $0x68] sm:$0xff]  ;;  %v71_v17 = vlaneseq }
  0x15   :  { %100 = vmatpush1.msra.mxu0 %v49_v23  ;;  %v46_v29 = vld [vmem:[%s1231_s1 + $0x48] sm:$0xff]  ;;  %622 = vmatpush3.msra.mxu1 %v416_v24  ;;  %v45_v30 = vld [vmem:[%s1231_s1 + $0x40] sm:$0xff]  ;;  %v44_v31 = vld [vmem:[%s1231_s1 + $0x38] sm:$0xff] }
  0x16   :  { %101 = vmatprep.subr.mxu0 %v48_v25  ;;  %623 = vmatprep.subr.mxu1 %v431_v26  ;;  %v43_v32 = vld [vmem:[%s1231_s1 + $0x30] sm:$0xff]  ;;  %v42_v33 = vld [vmem:[%s1231_s1 + $0x28] sm:$0xff]  ;;  %v41_v34 = vld [vmem:[%s1231_s1 + $0x20] sm:$0xff]  ;;  %v72_v18 = vshrl.u32 %v71_v17, 7 }
  0x17   :  { %102 = vmatpush1.msra.mxu0 %v47_v27  ;;  %624 = vmatpush3.msra.mxu1 %v415_v28  ;;  %v40_v35 = vld [vmem:[%s1231_s1 + $0x18] sm:$0xff]  ;;  %v39_v36 = vld [vmem:[%s1231_s1 + $0x10] sm:$0xff]  ;;  %v38_v37 = vld [vmem:[%s1231_s1 + $0x8] sm:$0xff] }
  0x18   :  { %103 = vmatprep.subr.mxu0 %v46_v29  ;;  %v37_v38 = vld [vmem:[%s1231_s1] sm:$0xff]  ;;  %v22_v40 = vld [vmem:[%s1230_s0 + $0x8] sm:$0xff]  ;;  %v23_v41 = vld [vmem:[%s1230_s0 + $0x10] sm:$0xff]  ;;  %v73_v19 = vsub.s32 0, %v72_v18  ;;  %v77_v21 = vsub.s32 1, %v72_v18 }
  0x19   :  { %104 = vmatpush1.msra.mxu0 %v45_v30  ;;  %v21_v39 = vld [vmem:[%s1230_s0] sm:$0xff]  ;;  %v24_v42 = vld [vmem:[%s1230_s0 + $0x18] sm:$0xff]  ;;  %v26_v44 = vld [vmem:[%s1230_s0 + $0x28] sm:$0xff] }
  0x1a   :  { %105 = vmatprep.subr.mxu0 %v44_v31  ;;  %v25_v43 = vld [vmem:[%s1230_s0 + $0x20] sm:$0xff]  ;;  %v27_v45 = vld [vmem:[%s1230_s0 + $0x30] sm:$0xff]  ;;  %v28_v46 = vld [vmem:[%s1230_s0 + $0x38] sm:$0xff] }
  0x1b   :  { %106 = vmatpush1.msra.mxu0 %v43_v32  ;;  %v29_v47 = vld [vmem:[%s1230_s0 + $0x40] sm:$0xff]  ;;  %v30_v48 = vld [vmem:[%s1230_s0 + $0x48] sm:$0xff]  ;;  %v31_v49 = vld [vmem:[%s1230_s0 + $0x50] sm:$0xff] }
  0x1c   :  { %107 = vmatprep.subr.mxu0 %v42_v33  ;;  %v32_v50 = vld [vmem:[%s1230_s0 + $0x58] sm:$0xff]  ;;  %v33_v51 = vld [vmem:[%s1230_s0 + $0x60] sm:$0xff]  ;;  %v34_v52 = vld [vmem:[%s1230_s0 + $0x68] sm:$0xff] }
  0x1d   :  { %108 = vmatpush1.msra.mxu0 %v41_v34  ;;  %v35_v53 = vld [vmem:[%s1230_s0 + $0x70] sm:$0xff]  ;;  %v36_v54 = vld [vmem:[%s1230_s0 + $0x78] sm:$0xff]  ;;  %v430_v55 = vld [vmem:[%s1233_s3 + $0xe0] sm:$0xff] }
  0x1e   :  { %109 = vmatprep.subr.mxu0 %v40_v35  ;;  %625 = vmatprep.subr.mxu1 %v430_v55  ;;  %v414_v56 = vld [vmem:[%s1233_s3 + $0x60] sm:$0xff]  ;;  %v429_v57 = vld [vmem:[%s1233_s3 + $0xd8] sm:$0xff]  ;;  %v428_v59 = vld [vmem:[%s1233_s3 + $0xd0] sm:$0xff] }
  0x1f   :  { %110 = vmatpush1.msra.mxu0 %v39_v36  ;;  %626 = vmatpush3.msra.mxu1 %v414_v56  ;;  %v413_v58 = vld [vmem:[%s1233_s3 + $0x58] sm:$0xff]  ;;  %v412_v60 = vld [vmem:[%s1233_s3 + $0x50] sm:$0xff]  ;;  %v427_v61 = vld [vmem:[%s1233_s3 + $0xc8] sm:$0xff] }
  0x20   :  { %111 = vmatprep.subr.mxu0 %v38_v37  ;;  %627 = vmatprep.subr.mxu1 %v429_v57  ;;  %v411_v62 = vld [vmem:[%s1233_s3 + $0x48] sm:$0xff]  ;;  %v426_v63 = vld [vmem:[%s1233_s3 + $0xc0] sm:$0xff]  ;;  %v425_v1 = vld [vmem:[%s1233_s3 + $0xb8] sm:$0xff] }
  0x21   :  { %112 = vmatpush1.msra.mxu0 %v37_v38  ;;  %628 = vmatpush3.msra.mxu1 %v413_v58  ;;  %v410_v0 = vld [vmem:[%s1233_s3 + $0x40] sm:$0xff]  ;;  %v409_v2 = vld [vmem:[%s1233_s3 + $0x38] sm:$0xff]  ;;  %v424_v3 = vld [vmem:[%s1233_s3 + $0xb0] sm:$0xff] }
  0x22   :  { %146 = vmatmul.mubr.f32.vlgmr.msra.gmra.mxu0 %v21_v39  ;;  %629 = vmatprep.subr.mxu1 %v428_v59  ;;  %v423_v5 = vld [vmem:[%s1233_s3 + $0xa8] sm:$0xff]  ;;  %v422_v7 = vld [vmem:[%s1233_s3 + $0xa0] sm:$0xff]  ;;  %v421_v9 = vld [vmem:[%s1233_s3 + $0x98] sm:$0xff] }
  0x23   :  { %151 = vmatprep.mubr.f32.mxu0 %v789_v4  ;;  %630 = vmatpush3.msra.mxu1 %v412_v60  ;;  %v407_v6 = vld [vmem:[%s1233_s3 + $0x28] sm:$0xff]  ;;  %v406_v8 = vld [vmem:[%s1233_s3 + $0x20] sm:$0xff]  ;;  %v405_v10 = vld [vmem:[%s1233_s3 + $0x18] sm:$0xff] }
  0x24   :  { %631 = vmatprep.subr.mxu1 %v427_v61  ;;  %v420_v11 = vld [vmem:[%s1233_s3 + $0x90] sm:$0xff]  ;;  %v419_v13 = vld [vmem:[%s1233_s3 + $0x88] sm:$0xff]  ;;  %v418_v15 = vld [vmem:[%s1233_s3 + $0x80] sm:$0xff] }
  0x25   :  { %632 = vmatpush3.msra.mxu1 %v411_v62  ;;  %v404_v12 = vld [vmem:[%s1233_s3 + $0x10] sm:$0xff]  ;;  %v403_v14 = vld [vmem:[%s1233_s3 + $0x8] sm:$0xff]  ;;  %v402_v16 = vld [vmem:[%s1233_s3] sm:$0xff] }
  0x26   :  { %152 = vmatmul.mubr.f32.gmra.mxu0 %v22_v40  ;;  %633 = vmatprep.subr.mxu1 %v426_v63  ;;  %v69_v20 = vld [vmem:[%s1232_s2] sm:$0x3] }
  0x27   :  { %157 = vmatprep.mubr.f32.mxu0 %v789_v4  ;;  %634 = vmatpush3.msra.mxu1 %v410_v0  ;;  %v1082_v22 = vrot.slane %v69_v20, %v73_v19  ;;  %v1084_v23 = vrot.slane %v69_v20, %v77_v21 }
  0x28   :  { %635 = vmatprep.subr.mxu1 %v425_v1 }
  0x29   :  { %636 = vmatpush3.msra.mxu1 %v409_v2 }
  0x2a   :  { %158 = vmatmul.mubr.f32.gmra.mxu0 %v23_v41  ;;  %637 = vmatprep.subr.mxu1 %v424_v3 }
  0x2b   :  { %163 = vmatprep.mubr.f32.mxu0 %v789_v4 }
  0x2e   :  { %164 = vmatmul.mubr.f32.gmra.mxu0 %v24_v42 }
  0x2f   :  { %169 = vmatprep.mubr.f32.mxu0 %v789_v4 }
  0x32   :  { %170 = vmatmul.mubr.f32.gmra.mxu0 %v25_v43 }
  0x33   :  { %175 = vmatprep.mubr.f32.mxu0 %v789_v4 }
  0x36   :  { %176 = vmatmul.mubr.f32.gmra.mxu0 %v26_v44 }
  0x37   :  { %181 = vmatprep.mubr.f32.mxu0 %v789_v4 }
  0x3a   :  { %182 = vmatmul.mubr.f32.gmra.mxu0 %v27_v45 }
  0x3b   :  { %187 = vmatprep.mubr.f32.mxu0 %v789_v4 }
  0x3e   :  { %188 = vmatmul.mubr.f32.gmra.mxu0 %v28_v46 }
  0x3f   :  { %193 = vmatprep.mubr.f32.mxu0 %v789_v4 }
  0x42   :  { %194 = vmatmul.mubr.f32.gmra.mxu0 %v29_v47 }
  0x43   :  { %199 = vmatprep.mubr.f32.mxu0 %v789_v4 }
  0x46   :  { %200 = vmatmul.mubr.f32.gmra.mxu0 %v30_v48 }
  0x47   :  { %205 = vmatprep.mubr.f32.mxu0 %v789_v4 }
  0x4a   :  { %206 = vmatmul.mubr.f32.gmra.mxu0 %v31_v49 }
  0x4b   :  { %211 = vmatprep.mubr.f32.mxu0 %v789_v4 }
  0x4e   :  { %212 = vmatmul.mubr.f32.gmra.mxu0 %v32_v50 }
  0x4f   :  { %217 = vmatprep.mubr.f32.mxu0 %v789_v4 }
  0x52   :  { %218 = vmatmul.mubr.f32.gmra.mxu0 %v33_v51 }
  0x53   :  { %223 = vmatprep.mubr.f32.mxu0 %v789_v4 }
  0x56   :  { %224 = vmatmul.mubr.f32.gmra.mxu0 %v34_v52 }
  0x57   :  { %229 = vmatprep.mubr.f32.mxu0 %v789_v4 }
  0x5a   :  { %230 = vmatmul.mubr.f32.gmra.mxu0 %v35_v53 }
  0x5b   :  { %235 = vmatprep.mubr.f32.mxu0 %v789_v4  ;;  %v408_v4 = vld [vmem:[%s1233_s3 + $0x30] sm:$0xff] }
  0x5c   :  { %638 = vmatpush3.msra.mxu1 %v408_v4 }
  0x5d   :  { %639 = vmatprep.subr.mxu1 %v423_v5 }
  0x5e   :  { %236 = vmatmul.mubr.f32.gmra.mxu0 %v36_v54  ;;  %640 = vmatpush3.msra.mxu1 %v407_v6 }
  0x5f   :  { %641 = vmatprep.subr.mxu1 %v422_v7 }
  0x60   :  { %642 = vmatpush3.msra.mxu1 %v406_v8 }
  0x61   :  { %643 = vmatprep.subr.mxu1 %v421_v9 }
  0x62   :  { %644 = vmatpush3.msra.mxu1 %v405_v10 }
  0x63   :  { %645 = vmatprep.subr.mxu1 %v420_v11 }
  0x64   :  { %646 = vmatpush3.msra.mxu1 %v404_v12 }
  0x65   :  { %647 = vmatprep.subr.mxu1 %v419_v13 }
  0x66   :  { %648 = vmatpush3.msra.mxu1 %v403_v14 }
  0x67   :  { %649 = vmatprep.subr.mxu1 %v418_v15 }
  0x68   :  { %650 = vmatpush3.msra.mxu1 %v402_v16 }
  0xe2   :  { %v147_v24 = vpop.f32.mrf.mxu0 }
  0xe3   :  { %v148_v25 = vadd.f32 %v147_v24, %v1082_v22 }
  0xe4   :  { %v149_v26 = vpop.f32.mrf.mxu0 }
  0xe5   :  { %v274_v27 = vmul.f32 0.70710677, %v148_v25  ;;  %v150_v28 = vadd.f32 %v149_v26, %v1084_v23  ;;  %v242_v60 = vmul.f32 0.5, %v148_v25 }
  0xe6   :  { %v153_v29 = vpop.f32.mrf.mxu0 }
  0xe7   :  { %703 = verf.f32 %v274_v27  ;;  %v275_v30 = vmul.f32 0.70710677, %v150_v28  ;;  %v154_v31 = vadd.f32 %v153_v29, %v1082_v22  ;;  %v243_v62 = vmul.f32 0.5, %v150_v28 }
  0xe8   :  { %v155_v32 = vpop.f32.mrf.mxu0 }
  0xe9   :  { %705 = verf.f32 %v275_v30  ;;  %v276_v33 = vmul.f32 0.70710677, %v154_v31  ;;  %v156_v34 = vadd.f32 %v155_v32, %v1084_v23  ;;  %v244_v13 = vmul.f32 0.5, %v154_v31 }
  0xea   :  { %v159_v35 = vpop.f32.mrf.mxu0 }
  0xeb   :  { %707 = verf.f32 %v276_v33  ;;  %v277_v36 = vmul.f32 0.70710677, %v156_v34  ;;  %v160_v37 = vadd.f32 %v159_v35, %v1082_v22  ;;  %v245_v10 = vmul.f32 0.5, %v156_v34 }
  0xec   :  { %v161_v38 = vpop.f32.mrf.mxu0 }
  0xed   :  { %709 = verf.f32 %v277_v36  ;;  %v278_v39 = vmul.f32 0.70710677, %v160_v37  ;;  %v162_v40 = vadd.f32 %v161_v38, %v1084_v23  ;;  %v246_v26 = vmul.f32 0.5, %v160_v37 }
  0xee   :  { %v165_v41 = vpop.f32.mrf.mxu0 }
  0xef   :  { %711 = verf.f32 %v278_v39  ;;  %v279_v42 = vmul.f32 0.70710677, %v162_v40  ;;  %v1093_v43 = vadd.f32 %v165_v41, %v1082_v22  ;;  %v247_v27 = vmul.f32 0.5, %v162_v40 }
  0xf0   :  { %v167_v44 = vpop.f32.mrf.mxu0 }
  0xf1   :  { %713 = verf.f32 %v279_v42  ;;  %v280_v45 = vmul.f32 0.70710677, %v1093_v43  ;;  %v1097_v46 = vadd.f32 %v167_v44, %v1084_v23  ;;  %v248_v44 = vmul.f32 0.5, %v1093_v43 }
  0xf2   :  { %v171_v47 = vpop.f32.mrf.mxu0 }
  0xf3   :  { %715 = verf.f32 %v280_v45  ;;  %v281_v48 = vmul.f32 0.70710677, %v1097_v46  ;;  %v1101_v49 = vadd.f32 %v171_v47, %v1082_v22  ;;  %v249_v40 = vmul.f32 0.5, %v1097_v46 }
  0xf4   :  { %v704_v50 = vpop.eup %703  ;;  %v173_v51 = vpop.f32.mrf.mxu0 }
  0xf5   :  { %717 = verf.f32 %v281_v48  ;;  %v282_v52 = vmul.f32 0.70710677, %v1101_v49  ;;  %v1105_v53 = vadd.f32 %v173_v51, %v1084_v23  ;;  %v338_v56 = vadd.f32 1.0, %v704_v50 }
  0xf6   :  { %v706_v54 = vpop.eup %705  ;;  %v177_v55 = vpop.f32.mrf.mxu0  ;;  %v250_v43 = vmul.f32 0.5, %v1101_v49 }
  0xf7   :  { %719 = verf.f32 %v282_v52  ;;  %v283_v57 = vmul.f32 0.70710677, %v1105_v53  ;;  %v1109_v58 = vadd.f32 %v177_v55, %v1082_v22  ;;  %v339_v63 = vadd.f32 1.0, %v706_v54 }
  0xf8   :  { %v708_v59 = vpop.eup %707  ;;  %v179_v61 = vpop.f32.mrf.mxu0  ;;  %v370_v5 = vmul.f32 %v338_v56, %v242_v60 }
  0xf9   :  { %721 = verf.f32 %v283_v57  ;;  %v284_v0 = vmul.f32 0.70710677, %v1109_v58  ;;  %v1113_v1 = vadd.f32 %v179_v61, %v1084_v23  ;;  %v371_v4 = vmul.f32 %v339_v63, %v243_v62 }
  0xfa   :  { %v710_v2 = vpop.eup %709  ;;  %v183_v3 = vpop.f32.mrf.mxu0  ;;  %v340_v8 = vadd.f32 1.0, %v708_v59  ;;  %v251_v57 = vmul.f32 0.5, %v1105_v53 }
  0xfb   :  { %723 = verf.f32 %v284_v0  ;;  %v285_v6 = vmul.f32 0.70710677, %v1113_v1  ;;  %v1117_v7 = vadd.f32 %v183_v3, %v1082_v22  ;;  %505 = vmatprep.mubr.f32.mxu1 %v371_v4  ;;  %v341_v12 = vadd.f32 1.0, %v710_v2 }
  0xfc   :  { %v712_v9 = vpop.eup %711  ;;  %v185_v11 = vpop.f32.mrf.mxu0  ;;  %506 = vmatmul.mubr.f32.vlgmr.msra.gmra.mxu1 %v370_v5  ;;  %v372_v24 = vmul.f32 %v340_v8, %v244_v13 }
  0xfd   :  { %725 = verf.f32 %v285_v6  ;;  %v286_v14 = vmul.f32 0.70710677, %v1117_v7  ;;  %v1121_v15 = vadd.f32 %v185_v11, %v1084_v23  ;;  %v373_v18 = vmul.f32 %v341_v12, %v245_v10 }
  0xfe   :  { %v714_v16 = vpop.eup %713  ;;  %v189_v17 = vpop.f32.mrf.mxu0  ;;  %v342_v19 = vadd.f32 1.0, %v712_v9  ;;  %v253_v6 = vmul.f32 0.5, %v1113_v1  ;;  %v252_v10 = vmul.f32 0.5, %v1109_v58  ;;  %v254_v58 = vmul.f32 0.5, %v1117_v7 }
  0xff   :  { %727 = verf.f32 %v286_v14  ;;  %v287_v20 = vmul.f32 0.70710677, %v1121_v15  ;;  %v1125_v21 = vadd.f32 %v189_v17, %v1082_v22  ;;  %510 = vmatprep.mubr.f32.mxu1 %v373_v18  ;;  %v343_v29 = vadd.f32 1.0, %v714_v16 }
 0x100   :  { %v716_v25 = vpop.eup %715  ;;  %v191_v28 = vpop.f32.mrf.mxu0  ;;  %511 = vmatmul.mubr.f32.gmra.mxu1 %v372_v24  ;;  %v374_v35 = vmul.f32 %v342_v19, %v246_v26  ;;  %v255_v24 = vmul.f32 0.5, %v1121_v15 }
 0x101   :  { %729 = verf.f32 %v287_v20  ;;  %v288_v30 = vmul.f32 0.70710677, %v1125_v21  ;;  %v1129_v31 = vadd.f32 %v191_v28, %v1084_v23  ;;  %v375_v34 = vmul.f32 %v343_v29, %v247_v27 }
 0x102   :  { %v718_v32 = vpop.eup %717  ;;  %v195_v33 = vpop.f32.mrf.mxu0  ;;  %v344_v38 = vadd.f32 1.0, %v716_v25 }
 0x103   :  { %731 = verf.f32 %v288_v30  ;;  %v289_v36 = vmul.f32 0.70710677, %v1129_v31  ;;  %v1133_v37 = vadd.f32 %v195_v33, %v1082_v22  ;;  %515 = vmatprep.mubr.f32.mxu1 %v375_v34  ;;  %v345_v42 = vadd.f32 1.0, %v718_v32 }
 0x104   :  { %v720_v39 = vpop.eup %719  ;;  %v197_v41 = vpop.f32.mrf.mxu0  ;;  %516 = vmatmul.mubr.f32.gmra.mxu1 %v374_v35  ;;  %v376_v55 = vmul.f32 %v344_v38, %v248_v44 }
 0x105   :  { %733 = verf.f32 %v289_v36  ;;  %v290_v45 = vmul.f32 0.70710677, %v1133_v37  ;;  %v1139_v47 = vadd.f32 %v197_v41, %v1084_v23  ;;  %v377_v51 = vmul.f32 %v345_v42, %v249_v40 }
 0x106   :  { %v722_v48 = vpop.eup %721  ;;  %v201_v50 = vpop.f32.mrf.mxu0  ;;  %v346_v52 = vadd.f32 1.0, %v720_v39  ;;  %v257_v36 = vmul.f32 0.5, %v1129_v31  ;;  %v256_v40 = vmul.f32 0.5, %v1125_v21  ;;  %v258_v21 = vmul.f32 0.5, %v1133_v37 }
 0x107   :  { %735 = verf.f32 %v290_v45  ;;  %v291_v54 = vmul.f32 0.70710677, %v1139_v47  ;;  %v1143_v46 = vadd.f32 %v201_v50, %v1082_v22  ;;  %520 = vmatprep.mubr.f32.mxu1 %v377_v51  ;;  %v347_v60 = vadd.f32 1.0, %v722_v48 }
 0x108   :  { %v724_v56 = vpop.eup %723  ;;  %v203_v59 = vpop.f32.mrf.mxu0  ;;  %521 = vmatmul.mubr.f32.gmra.mxu1 %v376_v55  ;;  %v378_v3 = vmul.f32 %v346_v52, %v250_v43  ;;  %v259_v55 = vmul.f32 0.5, %v1139_v47 }
 0x109   :  { %737 = verf.f32 %v291_v54  ;;  %v292_v61 = vmul.f32 0.70710677, %v1143_v46  ;;  %v1149_v62 = vadd.f32 %v203_v59, %v1084_v23  ;;  %v379_v2 = vmul.f32 %v347_v60, %v251_v57 }
 0x10a   :  { %v726_v63 = vpop.eup %725  ;;  %v207_v0 = vpop.f32.mrf.mxu0  ;;  %v348_v53 = vadd.f32 1.0, %v724_v56 }
 0x10b   :  { %739 = verf.f32 %v292_v61  ;;  %v293_v4 = vmul.f32 0.70710677, %v1149_v62  ;;  %v1153_v49 = vadd.f32 %v207_v0, %v1082_v22  ;;  %525 = vmatprep.mubr.f32.mxu1 %v379_v2  ;;  %v349_v9 = vadd.f32 1.0, %v726_v63 }
 0x10c   :  { %v728_v5 = vpop.eup %727  ;;  %v209_v8 = vpop.f32.mrf.mxu0  ;;  %526 = vmatmul.mubr.f32.gmra.mxu1 %v378_v3  ;;  %v380_v19 = vmul.f32 %v348_v53, %v252_v10 }
 0x10d   :  { %741 = verf.f32 %v293_v4  ;;  %v294_v11 = vmul.f32 0.70710677, %v1153_v49  ;;  %v1159_v12 = vadd.f32 %v209_v8, %v1084_v23  ;;  %v381_v16 = vmul.f32 %v349_v9, %v253_v6 }
 0x10e   :  { %v730_v13 = vpop.eup %729  ;;  %v213_v14 = vpop.f32.mrf.mxu0  ;;  %v350_v17 = vadd.f32 1.0, %v728_v5  ;;  %v261_v4 = vmul.f32 0.5, %v1149_v62  ;;  %v260_v6 = vmul.f32 0.5, %v1143_v46 }
 0x10f   :  { %743 = verf.f32 %v294_v11  ;;  %v295_v18 = vmul.f32 0.70710677, %v1159_v12  ;;  %v1163_v1 = vadd.f32 %v213_v14, %v1082_v22  ;;  %530 = vmatprep.mubr.f32.mxu1 %v381_v16  ;;  %v351_v26 = vadd.f32 1.0, %v730_v13 }
 0x110   :  { %v732_v20 = vpop.eup %731  ;;  %v215_v25 = vpop.f32.mrf.mxu0  ;;  %531 = vmatmul.mubr.f32.gmra.mxu1 %v380_v19  ;;  %v382_v33 = vmul.f32 %v350_v17, %v254_v58  ;;  %v262_v19 = vmul.f32 0.5, %v1153_v49  ;;  %v263_v46 = vmul.f32 0.5, %v1159_v12 }
 0x111   :  { %745 = verf.f32 %v295_v18  ;;  %v296_v27 = vmul.f32 0.70710677, %v1163_v1  ;;  %v1169_v28 = vadd.f32 %v215_v25, %v1084_v23  ;;  %v383_v32 = vmul.f32 %v351_v26, %v255_v24 }
 0x112   :  { %v734_v29 = vpop.eup %733  ;;  %v219_v30 = vpop.f32.mrf.mxu0  ;;  %v352_v15 = vadd.f32 1.0, %v732_v20  ;;  %v264_v12 = vmul.f32 0.5, %v1163_v1 }
 0x113   :  { %747 = verf.f32 %v296_v27  ;;  %v297_v34 = vmul.f32 0.70710677, %v1169_v28  ;;  %v1173_v7 = vadd.f32 %v219_v30, %v1082_v22  ;;  %535 = vmatprep.mubr.f32.mxu1 %v383_v32  ;;  %v353_v39 = vadd.f32 1.0, %v734_v29 }
 0x114   :  { %v736_v35 = vpop.eup %735  ;;  %v221_v38 = vpop.f32.mrf.mxu0  ;;  %536 = vmatmul.mubr.f32.gmra.mxu1 %v382_v33  ;;  %v384_v52 = vmul.f32 %v352_v15, %v256_v40  ;;  %v265_v27 = vmul.f32 0.5, %v1169_v28 }
 0x115   :  { %749 = verf.f32 %v297_v34  ;;  %v298_v41 = vmul.f32 0.70710677, %v1173_v7  ;;  %v1179_v42 = vadd.f32 %v221_v38, %v1084_v23  ;;  %v385_v48 = vmul.f32 %v353_v39, %v257_v36 }
 0x116   :  { %v738_v44 = vpop.eup %737  ;;  %v225_v45 = vpop.f32.mrf.mxu0  ;;  %v354_v50 = vadd.f32 1.0, %v736_v35  ;;  %v266_v39 = vmul.f32 0.5, %v1173_v7 }
 0x117   :  { %751 = verf.f32 %v298_v41  ;;  %v299_v51 = vmul.f32 0.70710677, %v1179_v42  ;;  %v1183_v31 = vadd.f32 %v225_v45, %v1082_v22  ;;  %540 = vmatprep.mubr.f32.mxu1 %v385_v48  ;;  %v355_v43 = vadd.f32 1.0, %v738_v44 }
 0x118   :  { %v740_v54 = vpop.eup %739  ;;  %v227_v56 = vpop.f32.mrf.mxu0  ;;  %541 = vmatmul.mubr.f32.gmra.mxu1 %v384_v52  ;;  %v386_v0 = vmul.f32 %v354_v50, %v258_v21 }
 0x119   :  { %753 = verf.f32 %v299_v51  ;;  %v300_v57 = vmul.f32 0.70710677, %v1183_v31  ;;  %v228_v59 = vadd.f32 %v227_v56, %v1084_v23  ;;  %v387_v63 = vmul.f32 %v355_v43, %v259_v55 }
 0x11a   :  { %v742_v60 = vpop.eup %741  ;;  %v231_v61 = vpop.f32.mrf.mxu0  ;;  %v356_v37 = vadd.f32 1.0, %v740_v54  ;;  %v268_v51 = vmul.f32 0.5, %v1183_v31 }
 0x11b   :  { %755 = verf.f32 %v300_v57  ;;  %v301_v2 = vmul.f32 0.70710677, %v228_v59  ;;  %v1190_v3 = vadd.f32 %v231_v61, %v1082_v22  ;;  %545 = vmatprep.mubr.f32.mxu1 %v387_v63  ;;  %v357_v5 = vadd.f32 1.0, %v742_v60 }
 0x11c   :  { %v744_v47 = vpop.eup %743  ;;  %v233_v53 = vpop.f32.mrf.mxu0  ;;  %546 = vmatmul.mubr.f32.gmra.mxu1 %v386_v0  ;;  %v388_v62 = vmul.f32 %v356_v37, %v260_v6  ;;  %v269_v44 = vmul.f32 0.5, %v228_v59 }
 0x11d   :  { %757 = verf.f32 %v301_v2  ;;  %v302_v8 = vmul.f32 0.70710677, %v1190_v3  ;;  %v234_v9 = vadd.f32 %v233_v53, %v1084_v23  ;;  %v389_v13 = vmul.f32 %v357_v5, %v261_v4  ;;  %v1209_v4 = vld [vmem:[%s1234_s4] ss:$0 sm:$0xff]  ;;  %s790_s4 = smov [#allocation2]  }
 0x11e   :  { %v746_v10 = vpop.eup %745  ;;  %v237_v11 = vpop.f32.mrf.mxu0  ;;  %v358_v14 = vadd.f32 1.0, %v744_v47  ;;  %v270_v43 = vmul.f32 0.5, %v1190_v3  ;;  %s607_s1 = sshll.u32 %s790_s4, 4  ;;  %s608_s1 = int_to_ptr.vmem [resolvable:$true] %s607_s1 }
 0x11f   :  { %759 = verf.f32 %v302_v8  ;;  %v303_v16 = vmul.f32 0.70710677, %v234_v9  ;;  %v238_v17 = vadd.f32 %v237_v11, %v1082_v22  ;;  %550 = vmatprep.mubr.f32.mxu1 %v389_v13  ;;  %v359_v58 = vadd.f32 1.0, %v746_v10  ;;  %s767_s25 = scalar_lea.vmem %s608_s1, 2048  ;;  %p772_p1 = scmp.lt.s32.totalorder %s608_s1, %s608_s1 }
 0x120   :  { %v748_v18 = vpop.eup %747  ;;  %v239_v20 = vpop.f32.mrf.mxu0  ;;  %551 = vmatmul.mubr.f32.gmra.mxu1 %v388_v62  ;;  %v390_v30 = vmul.f32 %v358_v14, %v262_v19  ;;  %v271_v54 = vmul.f32 0.5, %v234_v9  ;;  %p768_p0 = scmp.ne.s32.totalorder %s608_s1, %s767_s25  ;;  %p773_p2 = scmp.lt.s32.totalorder %s767_s25, %s767_s25 }
 0x121   :  { %761 = verf.f32 %v303_v16  ;;  %v304_v24 = vmul.f32 0.70710677, %v238_v17  ;;  %v240_v25 = vadd.f32 %v239_v20, %v1084_v23  ;;  %v391_v29 = vmul.f32 %v359_v58, %v263_v46 }
 0x122   :  { %v750_v26 = vpop.eup %749  ;;  %v360_v33 = vadd.f32 1.0, %v748_v18  ;;  %v267_v23 = vmul.f32 0.5, %v1179_v42  ;;  %v272_v31 = vmul.f32 0.5, %v238_v17  ;;  %p774_p3 = por %p773_p2, %p772_p1 }
 0x123   :  { %763 = verf.f32 %v304_v24  ;;  %v305_v22 = vmul.f32 0.70710677, %v240_v25  ;;  %v361_v32 = vadd.f32 1.0, %v750_v26  ;;  %555 = vmatprep.mubr.f32.mxu1 %v391_v29  ;;  %v273_v60 = vmul.f32 0.5, %v240_v25 }
 0x124   :  { %v752_v49 = vpop.eup %751  ;;  %556 = vmatmul.mubr.f32.gmra.mxu1 %v390_v30  ;;  %v392_v35 = vmul.f32 %v360_v33, %v264_v12  ;;  %p775_p4 = pnand %p774_p3, %p768_p0 }
 0x125   :  { %765 = verf.f32 %v305_v22  ;;  %v393_v34 = vmul.f32 %v361_v32, %v265_v27  ;;  %v362_v28 = vadd.f32 1.0, %v752_v49 }
 0x126   :  { %v754_v15 = vpop.eup %753 }
 0x127   :  { %560 = vmatprep.mubr.f32.mxu1 %v393_v34  ;;  %v363_v36 = vadd.f32 1.0, %v754_v15  ;;  %v394_v45 = vmul.f32 %v362_v28, %v266_v39 }
 0x128   :  { %v756_v38 = vpop.eup %755  ;;  %561 = vmatmul.mubr.f32.gmra.mxu1 %v392_v35 }
 0x129   :  { %v395_v40 = vmul.f32 %v363_v36, %v267_v23  ;;  %v364_v48 = vadd.f32 1.0, %v756_v38 }
 0x12a   :  { %v758_v41 = vpop.eup %757 }
 0x12b   :  { %565 = vmatprep.mubr.f32.mxu1 %v395_v40  ;;  %v365_v1 = vadd.f32 1.0, %v758_v41  ;;  %v396_v21 = vmul.f32 %v364_v48, %v268_v51 }
 0x12c   :  { %v760_v50 = vpop.eup %759  ;;  %566 = vmatmul.mubr.f32.gmra.mxu1 %v394_v45 }
 0x12d   :  { %v397_v42 = vmul.f32 %v365_v1, %v269_v44  ;;  %v366_v56 = vadd.f32 1.0, %v760_v50 }
 0x12e   :  { %v762_v52 = vpop.eup %761 }
 0x12f   :  { %570 = vmatprep.mubr.f32.mxu1 %v397_v42  ;;  %v367_v55 = vadd.f32 1.0, %v762_v52  ;;  %v398_v61 = vmul.f32 %v366_v56, %v270_v43 }
 0x130   :  { %v764_v7 = vpop.eup %763  ;;  %571 = vmatmul.mubr.f32.gmra.mxu1 %v396_v21 }
 0x131   :  { %v399_v57 = vmul.f32 %v367_v55, %v271_v54  ;;  %v368_v0 = vadd.f32 1.0, %v764_v7 }
 0x132   :  { %v766_v59 = vpop.eup %765 }
 0x133   :  { %575 = vmatprep.mubr.f32.mxu1 %v399_v57  ;;  %v369_v63 = vadd.f32 1.0, %v766_v59  ;;  %v400_v37 = vmul.f32 %v368_v0, %v272_v31 }
 0x134   :  { %576 = vmatmul.mubr.f32.gmra.mxu1 %v398_v61 }
 0x135   :  { %v401_v2 = vmul.f32 %v369_v63, %v273_v60 }
 0x137   :  { %580 = vmatprep.mubr.f32.mxu1 %v401_v2 }
 0x138   :  { %581 = vmatmul.mubr.f32.gmra.mxu1 %v400_v37 }
 0x1bc   :  { %v651_v47 = vpop.f32.mrf.mxu1 }
 0x1be   :  { %v652_v3 = vpop.f32.mrf.mxu1 }
 0x1bf   :  { %v653_v53 = vadd.f32 %v652_v3, %v651_v47 }
 0x1c0   :  { %v654_v5 = vpop.f32.mrf.mxu1 }
 0x1c1   :  { %v508_v6 = vadd.f32 %v653_v53, %v1209_v4 }
 0x1c2   :  { %v655_v8 = vpop.f32.mrf.mxu1 }
 0x1c3   :  { %586 = vst [vmem:[#allocation2] sm:$0xff] %v508_v6  ;;  %v656_v9 = vadd.f32 %v655_v8, %v654_v5 }
 0x1c4   :  { %v657_v10 = vpop.f32.mrf.mxu1 }
 0x1c5   :  { %v513_v11 = vadd.f32 %v656_v9, %v1209_v4 }
 0x1c6   :  { %v658_v13 = vpop.f32.mrf.mxu1 }
 0x1c7   :  { %587 = vst [vmem:[#allocation2 + $0x8] sm:$0xff] %v513_v11  ;;  %v659_v14 = vadd.f32 %v658_v13, %v657_v10 }
 0x1c8   :  { %v660_v16 = vpop.f32.mrf.mxu1 }
 0x1c9   :  { %v518_v17 = vadd.f32 %v659_v14, %v1209_v4 }
 0x1ca   :  { %v661_v62 = vpop.f32.mrf.mxu1 }
 0x1cb   :  { %588 = vst [vmem:[#allocation2 + $0x10] sm:$0xff] %v518_v17  ;;  %v662_v18 = vadd.f32 %v661_v62, %v660_v16 }
 0x1cc   :  { %v663_v19 = vpop.f32.mrf.mxu1 }
 0x1cd   :  { %v523_v46 = vadd.f32 %v662_v18, %v1209_v4 }
 0x1ce   :  { %v664_v20 = vpop.f32.mrf.mxu1 }
 0x1cf   :  { %589 = vst [vmem:[#allocation2 + $0x18] sm:$0xff] %v523_v46  ;;  %v665_v58 = vadd.f32 %v664_v20, %v663_v19 }
 0x1d0   :  { %v666_v24 = vpop.f32.mrf.mxu1 }
 0x1d1   :  { %v528_v25 = vadd.f32 %v665_v58, %v1209_v4 }
 0x1d2   :  { %v667_v26 = vpop.f32.mrf.mxu1 }
 0x1d3   :  { %590 = vst [vmem:[#allocation2 + $0x20] sm:$0xff] %v528_v25  ;;  %v668_v27 = vadd.f32 %v667_v26, %v666_v24 }
 0x1d4   :  { %v669_v29 = vpop.f32.mrf.mxu1 }
 0x1d5   :  { %v533_v30 = vadd.f32 %v668_v27, %v1209_v4 }
 0x1d6   :  { %v670_v22 = vpop.f32.mrf.mxu1 }
 0x1d7   :  { %591 = vst [vmem:[#allocation2 + $0x28] sm:$0xff] %v533_v30  ;;  %v671_v32 = vadd.f32 %v670_v22, %v669_v29 }
 0x1d8   :  { %v672_v33 = vpop.f32.mrf.mxu1 }
 0x1d9   :  { %v538_v49 = vadd.f32 %v671_v32, %v1209_v4 }
 0x1da   :  { %v673_v12 = vpop.f32.mrf.mxu1 }
 0x1db   :  { %592 = vst [vmem:[#allocation2 + $0x30] sm:$0xff] %v538_v49  ;;  %v674_v34 = vadd.f32 %v673_v12, %v672_v33 }
 0x1dc   :  { %v675_v15 = vpop.f32.mrf.mxu1 }
 0x1dd   :  { %v543_v23 = vadd.f32 %v674_v34, %v1209_v4 }
 0x1de   :  { %v676_v35 = vpop.f32.mrf.mxu1 }
 0x1df   :  { %593 = vst [vmem:[#allocation2 + $0x38] sm:$0xff] %v543_v23  ;;  %v677_v36 = vadd.f32 %v676_v35, %v675_v15 }
 0x1e0   :  { %v678_v28 = vpop.f32.mrf.mxu1 }
 0x1e1   :  { %v548_v38 = vadd.f32 %v677_v36, %v1209_v4 }
 0x1e2   :  { %v679_v39 = vpop.f32.mrf.mxu1 }
 0x1e3   :  { %594 = vst [vmem:[#allocation2 + $0x40] sm:$0xff] %v548_v38  ;;  %v680_v40 = vadd.f32 %v679_v39, %v678_v28 }
 0x1e4   :  { %v681_v41 = vpop.f32.mrf.mxu1 }
 0x1e5   :  { %v553_v44 = vadd.f32 %v680_v40, %v1209_v4 }
 0x1e6   :  { %v682_v45 = vpop.f32.mrf.mxu1 }
 0x1e7   :  { %595 = vst [vmem:[#allocation2 + $0x48] sm:$0xff] %v553_v44  ;;  %v683_v1 = vadd.f32 %v682_v45, %v681_v41 }
 0x1e8   :  { %v684_v48 = vpop.f32.mrf.mxu1 }
 0x1e9   :  { %v558_v50 = vadd.f32 %v683_v1, %v1209_v4 }
 0x1ea   :  { %v685_v51 = vpop.f32.mrf.mxu1 }
 0x1eb   :  { %596 = vst [vmem:[#allocation2 + $0x50] sm:$0xff] %v558_v50  ;;  %v686_v42 = vadd.f32 %v685_v51, %v684_v48 }
 0x1ec   :  { %v687_v52 = vpop.f32.mrf.mxu1 }
 0x1ed   :  { %v563_v54 = vadd.f32 %v686_v42, %v1209_v4 }
 0x1ee   :  { %v688_v21 = vpop.f32.mrf.mxu1 }
 0x1ef   :  { %597 = vst [vmem:[#allocation2 + $0x58] sm:$0xff] %v563_v54  ;;  %v689_v55 = vadd.f32 %v688_v21, %v687_v52 }
 0x1f0   :  { %v690_v56 = vpop.f32.mrf.mxu1 }
 0x1f1   :  { %v568_v7 = vadd.f32 %v689_v55, %v1209_v4 }
 0x1f2   :  { %v691_v43 = vpop.f32.mrf.mxu1 }
 0x1f3   :  { %598 = vst [vmem:[#allocation2 + $0x60] sm:$0xff] %v568_v7  ;;  %v692_v57 = vadd.f32 %v691_v43, %v690_v56 }
 0x1f4   :  { %v693_v59 = vpop.f32.mrf.mxu1 }
 0x1f5   :  { %v573_v60 = vadd.f32 %v692_v57, %v1209_v4 }
 0x1f6   :  { %v694_v61 = vpop.f32.mrf.mxu1 }
 0x1f7   :  { %599 = vst [vmem:[#allocation2 + $0x68] sm:$0xff] %v573_v60  ;;  %v695_v63 = vadd.f32 %v694_v61, %v693_v59 }
 0x1f8   :  { %v696_v0 = vpop.f32.mrf.mxu1 }
 0x1f9   :  { %v578_v31 = vadd.f32 %v695_v63, %v1209_v4 }
 0x1fa   :  { %v697_v2 = vpop.f32.mrf.mxu1 }
 0x1fb   :  { %600 = vst [vmem:[#allocation2 + $0x70] sm:$0xff] %v578_v31  ;;  %v698_v37 = vadd.f32 %v697_v2, %v696_v0 }
 0x1fd   :  { %v583_v47 = vadd.f32 %v698_v37, %v1209_v4 }
 0x1ff   :  { %601 = vst [vmem:[#allocation2 + $0x78] sm:$0xff] %v583_v47 }
 0x200   :  { %778 = shalt.err (!%p775_p4)
}
 0x201   :  { %s791_s26 = smov 128   ;;  %s792_s27 = smov 8  }
 0x202   :  { %613 = dma.vmem_to_hbm [thread:$0]  %s608_s1, 2048, %s1235_s5, [#allocation3], %s791_s26, %s791_s26, %s792_s27  }
 0x203   :  { %787 = dma.done.wait [#allocation3], 2048  }
 0x204   :  { %788 = vsyncadd [#allocation3], 4294965248 }
 0x205   :  { %617 = vsyncpa [#allocation3], 1 }

</bundles_post_ra>
